<compile_context>
chip_gen: v7x
topology: tpu7x:2x2x1
jax: 0.10.0
libtpu: 0.0.40
codegen_flags: <defaults>
</compile_context>

<pallas_src>
import jax
import jax.numpy as jnp
from jax.experimental import pallas as pl
from jax.experimental.pallas import tpu as pltpu


def _add_kernel(x_ref, o_ref):
    xv = x_ref[...]
    o_ref[...] = xv + xv


def _sublane_pack(dtype):
    itemsize = jnp.dtype(dtype).itemsize
    if itemsize >= 4:
        return 8
    if itemsize == 2:
        return 16
    return 32


def _vmem_capacity_bytes():
    try:
        return int(pltpu.get_tpu_info().vmem_capacity_bytes)
    except Exception:
        return 64 << 20  # conservative: assume v7x-sized VMEM


def _round_up(a, b):
    return ((a + b - 1) // b) * b


_SMALL_BYTES = 512 << 10      # in+out <= 512 KiB -> single full-array block
_LANE = 128
_MAX_COLS = 2048
_MIN_GRID_STEPS = 8           # pipelining + megacore (2 TCs on v7x)


def add_pallas(x, *, donate=False):
    """Element-wise x + x (== torch.add(x, x)) as a Pallas TPU kernel."""
    orig_shape = x.shape
    n = x.size
    if n == 0:
        return x  # empty: x + x == x

    itemsize = jnp.dtype(x.dtype).itemsize
    total_bytes = 2 * n * itemsize  # one HBM read + one HBM write
    cost = pl.CostEstimate(flops=n, transcendentals=0, bytes_accessed=total_bytes)

    # ---------- tiny inputs: one full-array block resident in VMEM ----------
    if total_bytes <= _SMALL_BYTES:
        x2 = x.reshape(1, n)
        out2 = pl.pallas_call(
            _add_kernel,
            out_shape=jax.ShapeDtypeStruct((1, n), x.dtype),
            in_specs=[pl.BlockSpec(memory_space=pltpu.MemorySpace.VMEM)],
            out_specs=pl.BlockSpec(memory_space=pltpu.MemorySpace.VMEM),
            cost_estimate=cost,
        )(x2)
        return out2.reshape(orig_shape)

    # ---------- large inputs: tiled, software-pipelined path ----------
    sub = _sublane_pack(x.dtype)
    vmem_cap = _vmem_capacity_bytes()
    big_vmem = vmem_cap >= (100 << 20)               # v5e / v6e (128 MiB VMEM)
    budget = (16 << 20) if big_vmem else (8 << 20)   # bytes per (in + out) block pair

    # Lane-dense flattened 2-D view; pad once if the element count is not a
    # multiple of 128 (elementwise op, so reshaping/padding preserves semantics).
    flat = x.reshape(-1)
    pad = (-n) % _LANE
    if pad:
        # TODO(synk): a masked-store last block would avoid this one pad copy.
        flat = jnp.pad(flat, (0, pad))
    m = flat.size

    cols = _LANE
    while (m % (cols * 2) == 0
           and cols * 2 <= _MAX_COLS
           and 2 * sub * (cols * 2) * itemsize <= budget):
        cols *= 2
    rows = m // cols
    x2 = flat.reshape(rows, cols)

    # Row tile from the byte budget, rounded to the dtype's sublane pack.
    max_tile = max(sub, (budget // (2 * cols * itemsize)) // sub * sub)
    tile = min(max_tile, _round_up(rows, sub))
    if tile >= rows:
        tile = rows  # single block == full dim is always legal
    # Keep enough grid steps for megacore sharding + pipelining when possible.
    if pl.cdiv(rows, tile) < _MIN_GRID_STEPS and rows >= _MIN_GRID_STEPS * sub:
        tile = max(sub, _round_up(pl.cdiv(rows, _MIN_GRID_STEPS), sub))

    # Explicit VMEM limit with headroom on v7x (64 MiB physical VMEM).
    vmem_limit = int(min(48 << 20, max(32 << 20, vmem_cap // 2)))

    out2 = pl.pallas_call(
        _add_kernel,
        out_shape=jax.ShapeDtypeStruct((rows, cols), x.dtype),
        grid=(pl.cdiv(rows, tile),),
        in_specs=[pl.BlockSpec((tile, cols), lambda i: (i, 0))],
        out_specs=pl.BlockSpec((tile, cols), lambda i: (i, 0)),
        compiler_params=pltpu.CompilerParams(
            dimension_semantics=("parallel",),
            vmem_limit_bytes=vmem_limit,
        ),
        cost_estimate=cost,
        input_output_aliases=({0: 0} if donate else {}),
    )(x2)

    out_flat = out2.reshape(m)
    if pad:
        out_flat = out_flat[:n]
    return out_flat.reshape(orig_shape)


if __name__ == "__main__":
    # Shape implied by the module spec: x = torch.randn(2, 2)
    key = jax.random.PRNGKey(0)
    x_small = jax.random.normal(key, (2, 2), dtype=jnp.float32)
    out_small = jax.block_until_ready(add_pallas(x_small))
    assert out_small.shape == x_small.shape and out_small.dtype == x_small.dtype
    assert jnp.allclose(out_small, x_small + x_small), "mismatch vs x + x (small)"

    # Tiled / pipelined path, lane-aligned f32.
    x_big = jax.random.normal(jax.random.PRNGKey(1), (1024, 256), dtype=jnp.float32)
    out_big = jax.block_until_ready(add_pallas(x_big))
    assert jnp.allclose(out_big, x_big + x_big), "mismatch vs x + x (tiled)"

    # Non-128-multiple element count + sub-32-bit dtype (padded, tiled path).
    x_odd = jax.random.normal(jax.random.PRNGKey(2), (1000, 300), dtype=jnp.bfloat16)
    out_odd = jax.block_until_ready(add_pallas(x_odd))
    assert out_odd.dtype == x_odd.dtype
    assert jnp.allclose(out_odd.astype(jnp.float32),
                        (x_odd + x_odd).astype(jnp.float32)), "mismatch (padded path)"

    print("KERNEL_OK")
</pallas_src>

<mosaic_0001>
module attributes {stable_mosaic.version = 11 : i64} {
  func.func @_add_kernel(%arg0: memref<1x4xf32, #tpu.memory_space<vmem>>, %arg1: memref<1x4xf32, #tpu.memory_space<vmem>>) attributes {dimension_semantics = [], scalar_prefetch = 0 : i64, scratch_operands = 0 : i64, tpu.core_type = #tpu.core_type<tc>} {
    %c0 = arith.constant 0 : index
    %c0_0 = arith.constant 0 : index
    %0 = vector.load %arg0[%c0, %c0_0] : memref<1x4xf32, #tpu.memory_space<vmem>>, vector<1x4xf32>
    %1 = arith.addf %0, %0 : vector<1x4xf32>
    %c0_1 = arith.constant 0 : index
    %c0_2 = arith.constant 0 : index
    %2 = vector.load %arg1[%c0_1, %c0_2] : memref<1x4xf32, #tpu.memory_space<vmem>>, vector<1x4xf32>
    tpu.vector_store %arg1[%c0_1, %c0_2], %1 {strides = array<i32>} : memref<1x4xf32, #tpu.memory_space<vmem>>, vector<1x4xf32>,
    return
  }
}

</mosaic_0001>

<bundles_post_ra>
// kernel: tpu_custom_call.1
= control target key start
LH: loop header
LB: loop body
LE: loop exit
PB: predicated region body
PF: predicated region fallthrough
CT: control target
= control target key end

     0   :  { %6 = vsyncpa [#allocation3], 0  ;;  %s126_s0 = inlined_call_operand.hbm [shape: f32[1,4], index: 0, kind: input, shape index: {}]   ;;  %s127_s1 = inlined_call_operand.hbm [shape: f32[1,4], index: 1, kind: output, shape index: {}]  }
   0x1   :  { %7 = vsyncpa [#allocation4], 0  ;;  %s90_s6 = smov [#allocation2]   ;;  %s42_s10 = scalar_lea.hbm %s126_s0, 16 }
   0x2   :  { %s14_s7 = sshll.u32 %s90_s6, 4  ;;  %p43_p0 = scmp.ne.s32.totalorder %s126_s0, %s42_s10  ;;  %s15_s7 = int_to_ptr.vmem [resolvable:$true] %s14_s7 }
   0x3   :  { %p46_p1 = scmp.lt.u32.totalorder %s42_s10, %s126_s0 }
   0x5   :  { %p48_p2 = pnand %p46_p1, %p43_p0 }
   0x7   :  { %51 = shalt.err (!%p48_p2)
}
   0x8   :  { %s52_s15 = scalar_lea.vmem %s15_s7, 16  ;;  %s56_s16 = scalar_lea.vmem %s15_s7, 32 }
   0x9   :  { %p53_p3 = scmp.ne.s32.totalorder %s15_s7, %s52_s15  ;;  %p57_p4 = scmp.lt.s32.totalorder %s15_s7, %s15_s7 }
   0xa   :  { %p58_p5 = scmp.lt.s32.totalorder %s56_s16, %s52_s15 }
   0xc   :  { %p59_p6 = por %p58_p5, %p57_p4 }
   0xe   :  { %p60_p7 = pnand %p59_p6, %p53_p3 }
  0x10   :  { %63 = shalt.err (!%p60_p7)
}
  0x11   :  { %17 = dma.hbm_to_vmem [thread:$0]  %s126_s0, 16, %s15_s7, [#allocation3]  }
  0x12   :  { %86 = dma.done.wait [#allocation3], 16  }
  0x13   :  { %87 = vsyncadd [#allocation3], 4294967280  ;;  %s91_s19 = smov [#allocation5]   ;;  %v21_v0 = vld [vmem:[#allocation2] sm:$0x1]  ;;  %vm23_vm0 = vcmask 24576  }
  0x14   :  { %s31_s20 = sshll.u32 %s91_s19, 4  ;;  %v22_v1 = vadd.f32 %v21_v0, %v21_v0  ;;  %s32_s20 = int_to_ptr.vmem [resolvable:$true] %s31_s20 }
  0x15   :  { %s64_s21 = scalar_lea.vmem %s32_s20, 16  ;;  %s68_s22 = scalar_lea.vmem %s32_s20, 32 }
  0x16   :  { %24 = vst.msk [vmem:[#allocation5] sm:$0x1] %vm23_vm0, %v22_v1  ;;  %p65_p8 = scmp.ne.s32.totalorder %s32_s20, %s64_s21  ;;  %p69_p9 = scmp.lt.s32.totalorder %s32_s20, %s32_s20 }
  0x17   :  { %p70_p10 = scmp.lt.s32.totalorder %s68_s22, %s64_s21 }
  0x19   :  { %p71_p11 = por %p70_p10, %p69_p9 }
  0x1b   :  { %p72_p12 = pnand %p71_p11, %p65_p8 }
  0x1d   :  { %75 = shalt.err (!%p72_p12)
}
  0x1e   :  { %s76_s0 = scalar_lea.hbm %s127_s1, 16 }
  0x1f   :  { %p77_p13 = scmp.ne.s32.totalorder %s127_s1, %s76_s0  ;;  %p80_p0 = scmp.lt.u32.totalorder %s76_s0, %s127_s1 }
  0x21   :  { %p82_p1 = pnand %p80_p0, %p77_p13 }
  0x23   :  { %85 = shalt.err (!%p82_p1)
}
  0x24   :  { %34 = dma.vmem_to_hbm [thread:$0]  %s32_s20, 16, %s127_s1, [#allocation4]  }
  0x25   :  { %88 = dma.done.wait [#allocation4], 16  }
  0x26   :  { %89 = vsyncadd [#allocation4], 4294967280 }
  0x27   :  { %38 = vsyncpa [#allocation3], 1 }
  0x28   :  { %39 = vsyncpa [#allocation4], 1 }

</bundles_post_ra>
